<compile_context>
chip_gen: v5e
topology: v5e:2x2
jax: 0.10.0
libtpu: 0.0.40
codegen_flags: <defaults>
</compile_context>

<pallas_src>
import math

import jax
import jax.numpy as jnp
from jax.experimental import pallas as pl
from jax.experimental.pallas import tpu as pltpu


def make_positional_encoding(max_len: int, d_model: int) -> jnp.ndarray:
    """Deterministic PE buffer, identical to the PyTorch __init__ construction.

    Returns pe of shape [max_len, d_model] (the singleton batch dim dropped).
    """
    position = jnp.arange(max_len, dtype=jnp.float32)[:, None]            # [max_len, 1]
    div_term = jnp.exp(
        jnp.arange(0, d_model, 2, dtype=jnp.float32)
        * (-math.log(10000.0) / d_model)
    )                                                                     # [ceil(d_model/2)]
    angles = position * div_term                                          # [max_len, ceil(d_model/2)]
    pe = jnp.zeros((max_len, d_model), dtype=jnp.float32)
    pe = pe.at[:, 0::2].set(jnp.sin(angles))
    # Guard odd d_model (cos column count is d_model // 2).
    pe = pe.at[:, 1::2].set(jnp.cos(angles)[:, : d_model // 2])
    return pe


def _pe_add_kernel(x_ref, pe_ref, o_ref):
    # x_ref / o_ref: (TB, TC) lane-dense block; pe_ref: (1, TC) f32, broadcast
    # over rows.  Accumulate in f32 and round once into the output dtype.
    o_ref[...] = (x_ref[...].astype(jnp.float32) + pe_ref[...]).astype(o_ref.dtype)


def _sublane_align(itemsize: int) -> int:
    # Native sublane tile grows as the dtype narrows: f32 -> 8, bf16 -> 16,
    # int8/fp8 -> 32.  Always a multiple of 8 so the (8, 128) rule holds.
    return max(8, 32 // itemsize)


def positional_encoder_forward(
    x: jnp.ndarray,
    pe_full: jnp.ndarray,
    *,
    target_block_bytes: int = 4 * 1024 * 1024,
) -> jnp.ndarray:
    """x: [B, S, E]; pe_full: [max_len, E] (f32, max_len >= S). Returns [B, S, E]."""
    B, S, E = x.shape
    max_len = pe_full.shape[0]
    SE = S * E
    itemsize = jnp.dtype(x.dtype).itemsize
    sub = _sublane_align(itemsize)

    # Lane-dense layout: flatten (S, E) into one last axis so the output block
    # last dim is a multiple of 128 (full vst, not masked partial stores).
    #   out[b, s*E + e] = x[b, s*E + e] + pe_flat[s*E + e]
    x2d = x.reshape(B, SE)
    # Metadata-only reshape of the full (f32) pe buffer -- no per-call copy,
    # no wrapper-side astype.
    pe2d = pe_full.reshape(1, max_len * E)

    # --- fixed, aligned tile sizes; ragged edges handled by cdiv + masking ---
    if SE < 128:
        TC = SE                                     # full dim -> always legal
    else:
        lane_cap = max(128, (target_block_bytes // (sub * itemsize)) // 128 * 128)
        TC = min(lane_cap, (SE // 128) * 128)       # multiple of 128
    if B < sub:
        TB = B                                      # full dim -> always legal
    else:
        row_cap = max(sub, (target_block_bytes // (TC * itemsize)) // sub * sub)
        TB = min(row_cap, (B // sub) * sub)         # multiple of sublane tile

    # Grid order: lane-tile axis OUTER, batch-tile axis INNER.  The pe block
    # index (0, j) is then constant across consecutive inner iterations and
    # Pallas skips its re-DMA.
    grid = (pl.cdiv(SE, TC), pl.cdiv(B, TB))

    out2d = pl.pallas_call(
        _pe_add_kernel,
        out_shape=jax.ShapeDtypeStruct((B, SE), x.dtype),
        grid=grid,
        in_specs=[
            pl.BlockSpec((TB, TC), lambda j, i: (i, j)),   # x rows, lane-dense
            pl.BlockSpec((1, TC), lambda j, i: (0, j)),    # pe tile, reused over batch
        ],
        out_specs=pl.BlockSpec((TB, TC), lambda j, i: (i, j)),
        compiler_params=pltpu.CompilerParams(
            # Purely elementwise: every grid point independent -> both axes
            # parallel (lets v7x shard the grid across its two TensorCores).
            dimension_semantics=("parallel", "parallel"),
            # ~17 MiB double-buffered working set at 4 MiB tiles; 48 MiB is
            # within physical VMEM on v5e/v6e (128 MiB) and v7x (64 MiB).
            vmem_limit_bytes=48 * 1024 * 1024,
        ),
    )(x2d, pe2d)

    return out2d.reshape(B, S, E)


if __name__ == "__main__":
    # config-equivalent: d_model=32, dropout=0.1 (eval -> identity), max_len=5000
    B, S, d_model = 2, 8, 32
    max_len = 5000

    key = jax.random.PRNGKey(0)
    x = jax.random.normal(key, (B, S, d_model), dtype=jnp.float32)

    pe_full = make_positional_encoding(max_len, d_model)

    out = positional_encoder_forward(x, pe_full)
    out = jax.block_until_ready(out)

    # Sanity check against a plain-JAX reference of the same math.
    ref = x + pe_full[:S][None, :, :]
    assert out.shape == (B, S, d_model)
    assert jnp.allclose(out, ref, atol=1e-6), "mismatch vs reference"

    print("KERNEL_OK")
</pallas_src>

<mosaic_0001>
module attributes {stable_mosaic.version = 11 : i64} {
  func.func @_pe_add_kernel(%arg0: i32, %arg1: i32, %arg2: memref<2x256xf32, #tpu.memory_space<vmem>>, %arg3: memref<1x256xf32, #tpu.memory_space<vmem>>, %arg4: memref<2x256xf32, #tpu.memory_space<vmem>>) attributes {dimension_semantics = [#tpu.dimension_semantics<parallel>, #tpu.dimension_semantics<parallel>], iteration_bounds = array<i64: 1, 1>, scalar_prefetch = 0 : i64, scratch_operands = 0 : i64, tpu.core_type = #tpu.core_type<tc>, window_params = [{transform_indices = @transform_0, window_bounds = array<i64: 2, 256>}, {transform_indices = @transform_1, window_bounds = array<i64: 1, 256>}, {transform_indices = @transform_2, window_bounds = array<i64: 2, 256>}]} {
    %c0 = arith.constant 0 : index
    %c0_0 = arith.constant 0 : index
    %0 = vector.load %arg2[%c0, %c0_0] : memref<2x256xf32, #tpu.memory_space<vmem>>, vector<2x256xf32>
    %c0_1 = arith.constant 0 : index
    %c0_2 = arith.constant 0 : index
    %1 = vector.load %arg3[%c0_1, %c0_2] : memref<1x256xf32, #tpu.memory_space<vmem>>, vector<1x256xf32>
    %2 = vector.broadcast %1 : vector<1x256xf32> to vector<2x256xf32>
    %3 = arith.addf %0, %2 : vector<2x256xf32>
    %c0_3 = arith.constant 0 : index
    %c0_4 = arith.constant 0 : index
    %4 = vector.load %arg4[%c0_3, %c0_4] : memref<2x256xf32, #tpu.memory_space<vmem>>, vector<2x256xf32>
    tpu.vector_store %arg4[%c0_3, %c0_4], %3 {strides = array<i32>} : memref<2x256xf32, #tpu.memory_space<vmem>>, vector<2x256xf32>,
    return
  }
  func.func @transform_0(%arg0: i32, %arg1: i32) -> (i32, i32) {
    %c0_i32 = arith.constant 0 : i32
    return %arg1, %arg0 : i32, i32
  }
  func.func @transform_1(%arg0: i32, %arg1: i32) -> (i32, i32) {
    %c0_i32 = arith.constant 0 : i32
    %c0_i32_0 = arith.constant 0 : i32
    return %c0_i32, %arg0 : i32, i32
  }
  func.func @transform_2(%arg0: i32, %arg1: i32) -> (i32, i32) {
    %c0_i32 = arith.constant 0 : i32
    return %arg1, %arg0 : i32, i32
  }
}

</mosaic_0001>

<bundles_post_ra>
// kernel: tpu_custom_call.1
= control target key start
LH: loop header
LB: loop body
LE: loop exit
PB: predicated region body
PF: predicated region fallthrough
CT: control target
= control target key end

     0   :  { %7 = vsyncpa [#allocation3], 0  ;;  %s177_s0 = inlined_call_operand.hbm [shape: f32[2,256], index: 0, kind: input, shape index: {}]   ;;  %s178_s1 = inlined_call_operand.hbm [shape: f32[1,160000], index: 1, kind: input, shape index: {}]   ;;  %s179_s2 = inlined_call_operand.hbm [shape: f32[2,256], index: 2, kind: output, shape index: {}]  }
   0x1   :  { %8 = vsyncpa [#allocation6], 0 }
   0x2   :  { %9 = vsyncpa [#allocation4], 0  ;;  %s15_s11 = sshll.u32 %s177_s0, 4  ;;  %s150_s12 = smov [#allocation2]   ;;  %s16_s11 = int_to_ptr.hbm [resolvable:$true] %s15_s11 }
   0x3   :  { %s17_s13 = sshll.u32 %s150_s12, 4  ;;  %s26_s16 = sshll.u32 %s178_s1, 4  ;;  %s18_s13 = int_to_ptr.vmem [resolvable:$true] %s17_s13  ;;  %s27_s16 = int_to_ptr.hbm [resolvable:$true] %s26_s16 }
   0x4   :  { %20 = dma.hbm_to_vmem [thread:$0]  %s16_s11, 64, %s18_s13, [#allocation3]  }
   0x5   :  { %s151_s17 = smov [#allocation5]  }
   0x6   :  { %s28_s18 = sshll.u32 %s151_s17, 4  ;;  %s29_s18 = int_to_ptr.vmem [resolvable:$true] %s28_s18 }
   0x7   :  { %31 = dma.hbm_to_vmem [thread:$0]  %s27_s16, 32, %s29_s18, [#allocation6]  }
   0x8   :  { %144 = dma.done.wait [#allocation3], 64  }
   0x9   :  { %145 = vsyncadd [#allocation3], 4294967232 }
   0xa   :  { %146 = dma.done.wait [#allocation6], 32  }
   0xb   :  { %147 = vsyncadd [#allocation6], 4294967264  ;;  %v41_v0 = vld [vmem:[#allocation5] sm:$0x3]  ;;  %vm46_vm0 = vcmask 1041408   ;;  %s152_s0 = smov [#allocation7]  }
   0xc   :  { %v43_v1 = vperm.slane %v41_v0, 0  ;;  %v44_v2 = vperm.slane %v41_v0, 1  ;;  %v40_v3 = vld [vmem:[#allocation2] sm:$0xf]  ;;  %s56_s19 = sshll.u32 %s152_s0, 4  ;;  %s58_s21 = sshll.u32 %s179_s2, 4  ;;  %s57_s19 = int_to_ptr.vmem [resolvable:$true] %s56_s19  ;;  %s59_s21 = int_to_ptr.hbm [resolvable:$true] %s58_s21 }
   0xe   :  { %v45_v4 = vrot.slane %v44_v2, 6 }
  0x10   :  { %v47_v5 = vsel %vm46_vm0, %v43_v1, %v45_v4 }
  0x11   :  { %v49_v6 = vadd.f32 %v47_v5, %v40_v3 }
  0x13   :  { %50 = vst [vmem:[#allocation7] sm:$0xf] %v49_v6 }
  0x14   :  { %61 = dma.vmem_to_hbm [thread:$0]  %s57_s19, 64, %s59_s21, [#allocation4]  }
  0x15   :  { %148 = dma.done.wait [#allocation4], 64  }
  0x16   :  { %149 = vsyncadd [#allocation4], 4294967232 }
  0x17   :  { %66 = vsyncpa [#allocation3], 1 }
  0x18   :  { %67 = vsyncpa [#allocation6], 1 }
  0x19   :  { %68 = vsyncpa [#allocation4], 1 }

</bundles_post_ra>
